<compile_context>
chip_gen: v5e
topology: v5e:2x2
jax: 0.10.0
libtpu: 0.0.40
codegen_flags: <defaults>
</compile_context>

<pallas_src>
import functools

import jax
import jax.numpy as jnp
from jax.experimental import pallas as pl
from jax.experimental.pallas import tpu as pltpu


def _round_up(n, m):
    return ((n + m - 1) // m) * m


def _device_info():
    """(has_megacore, vmem_budget_bytes) with safe fallbacks."""
    kind = ""
    try:
        kind = jax.devices()[0].device_kind.lower().replace(" ", "")
    except Exception:
        pass
    # Chips with 2 TensorCores per device (megacore / v7x).
    megacore = any(t in kind for t in ("v4", "v5p", "v7", "tpu7"))
    vmem = 64 << 20  # conservative default (v7x physical VMEM)
    try:
        info = pltpu.get_tpu_info()
        vmem = int(getattr(info, "vmem_capacity_bytes", vmem))
    except Exception:
        pass
    return megacore, vmem


def _pick_bblk(b, per_img_bytes, vmem_budget, megacore, target_bytes=4 << 20):
    """Images packed per grid step: ~4 MiB blocks, bounded by VMEM budget."""
    # x is both read and written; each side double-buffered => ~4x block bytes.
    vmem_cap = max(1, int(0.6 * vmem_budget) // max(4 * per_img_bytes, 1))
    bblk = max(1, min(b, target_bytes // max(per_img_bytes, 1), vmem_cap))
    if megacore:
        # Keep >= 2 grid steps only when there are 2 TensorCores to shard over.
        while bblk > 1 and (b // bblk) < 2:
            bblk -= 1
    while b % bblk != 0:
        bblk -= 1
    return max(1, bblk)


def _pick_hw_tile(c, dtype_bytes, target_bytes=2 << 20):
    thw = (target_bytes // max(c * dtype_bytes, 1)) // 128 * 128
    return max(128, thw)


# -----------------------------------------------------------------------------
# Single-block path: whole (C, HW) image per batch element resident in VMEM.
# -----------------------------------------------------------------------------
def _ca_single_kernel(x_ref, wq_w_ref, wq_b_ref, wv_w_ref, wv_b_ref,
                      wz_w_ref, wz_b_ref, ln_g_ref, ln_b_ref, o_ref,
                      *, bblk, hw_valid):
    hw_pad = x_ref.shape[-1]
    if hw_valid is not None:
        # Hoisted once per grid step (padded lanes beyond hw_valid).
        valid = jax.lax.broadcasted_iota(jnp.int32, (1, hw_pad), 1) < hw_valid
    else:
        valid = None

    def one_image(j):
        # wq = Wq @ x + b_q : (1, HW).  x is re-read from VMEM at each use
        # site so the full (C, HW) slab never stays live in vregs.
        wq = jnp.dot(wq_w_ref[...], x_ref[j],
                     preferred_element_type=jnp.float32) + wq_b_ref[...]
        if valid is not None:
            wq = jnp.where(valid, wq, -jnp.inf)      # padded lanes -> exp() = 0

        # Softmax stats over the spatial (lane) axis, normalization deferred.
        m = jnp.max(wq, axis=-1, keepdims=True)
        e = jnp.exp(wq - m)                          # (1, HW)
        s = jnp.sum(e, axis=-1, keepdims=True)       # (1, 1)
        inv_s = pl.reciprocal(s, approx=True)

        # Pooled x under unnormalized softmax weights: MXU contraction over HW.
        xe = jax.lax.dot_general(x_ref[j], e, (((1,), (1,)), ((), ())),
                                 preferred_element_type=jnp.float32)  # (C, 1)

        # wz = Wv @ (x p^T) + b_v  (softmax weights sum to 1).
        wz = jnp.dot(wv_w_ref[...], xe,
                     preferred_element_type=jnp.float32) * inv_s + wv_b_ref[...]
        z = jnp.dot(wz_w_ref[...], wz,
                    preferred_element_type=jnp.float32) + wz_b_ref[...]  # (C, 1)

        # LayerNorm over channels (eps=1e-5, biased var), then sigmoid.
        mu = jnp.mean(z, axis=0, keepdims=True)
        var = jnp.mean((z - mu) ** 2, axis=0, keepdims=True)
        zn = (z - mu) * jax.lax.rsqrt(var + 1e-5)
        weight = jax.nn.sigmoid(zn * ln_g_ref[...] + ln_b_ref[...])      # (C, 1)

        # Third VMEM read of x for the broadcast multiply over the lane axis.
        o_ref[j] = (x_ref[j] * weight).astype(o_ref.dtype)

    if bblk <= 4:
        for j in range(bblk):
            one_image(j)
    else:
        # Bound live ranges for larger packs; small unroll for LLO visibility.
        def loop_body(j, carry):
            one_image(j)
            return carry
        jax.lax.fori_loop(0, bblk, loop_body, 0, unroll=2)


def _channel_attention_single(x_bch, params, hw, hw_pad, per_img_bytes,
                              weight_bytes, megacore, vmem_budget):
    b, c, _ = x_bch.shape
    wv_w, wv_b, wq_w, wq_b, wz_w, wz_b, ln_g, ln_b = params

    hw_valid = hw if hw_pad != hw else None
    if hw_valid is not None:
        # Lane-dense output: pad HW up to a multiple of 128 (masked in-kernel).
        x_bch = jnp.pad(x_bch, ((0, 0), (0, 0), (0, hw_pad - hw)))

    bblk = _pick_bblk(b, per_img_bytes, vmem_budget, megacore)
    grid = (b // bblk,)
    block_bytes = bblk * per_img_bytes
    vmem_limit = int(min(0.9 * vmem_budget,
                         max(32 << 20,
                             4 * block_bytes + 2 * weight_bytes + (4 << 20))))

    full = lambda arr: pl.BlockSpec(arr.shape, lambda i: (0,) * arr.ndim)

    out = pl.pallas_call(
        functools.partial(_ca_single_kernel, bblk=bblk, hw_valid=hw_valid),
        out_shape=jax.ShapeDtypeStruct((b, c, hw_pad), x_bch.dtype),
        grid_spec=pltpu.PrefetchScalarGridSpec(
            num_scalar_prefetch=0,
            grid=grid,
            in_specs=[
                pl.BlockSpec((bblk, c, hw_pad), lambda i: (i, 0, 0)),   # x
                full(wq_w), full(wq_b), full(wv_w), full(wv_b),
                full(wz_w), full(wz_b), full(ln_g), full(ln_b),
            ],
            out_specs=pl.BlockSpec((bblk, c, hw_pad), lambda i: (i, 0, 0)),
        ),
        compiler_params=pltpu.CompilerParams(
            dimension_semantics=("parallel",),
            vmem_limit_bytes=vmem_limit),
    )(x_bch, wq_w, wq_b, wv_w, wv_b, wz_w, wz_b, ln_g, ln_b)

    if hw_valid is not None:
        out = out[:, :, :hw]
    return out


# -----------------------------------------------------------------------------
# HW-tiled two-pass path for feature maps too large to hold per grid step
# (e.g. v7x's 64 MiB VMEM): online-softmax weight kernel + streaming apply.
# -----------------------------------------------------------------------------
def _ca_weight_kernel(x_ref, wq_w_ref, wq_b_ref, wv_w_ref, wv_b_ref,
                      wz_w_ref, wz_b_ref, ln_g_ref, ln_b_ref,
                      w_ref, m_sc, s_sc, xe_sc, *, hw_valid, thw):
    k = pl.program_id(1)

    @pl.when(k == 0)
    def _():
        m_sc[...] = jnp.full_like(m_sc, -jnp.inf)
        s_sc[...] = jnp.zeros_like(s_sc)
        xe_sc[...] = jnp.zeros_like(xe_sc)

    wq = jnp.dot(wq_w_ref[...], x_ref[0],
                 preferred_element_type=jnp.float32) + wq_b_ref[...]   # (1, thw)
    if hw_valid is not None:
        lane = jax.lax.broadcasted_iota(jnp.int32, (1, thw), 1) + k * thw
        wq = jnp.where(lane < hw_valid, wq, -jnp.inf)

    # Online (rescaled) accumulation of the unnormalized softmax pooling.
    m_prev = m_sc[...]
    m_new = jnp.maximum(m_prev, jnp.max(wq, axis=-1, keepdims=True))
    alpha = jnp.exp(m_prev - m_new)
    e = jnp.exp(wq - m_new)                                            # (1, thw)
    s_sc[...] = alpha * s_sc[...] + jnp.sum(e, axis=-1, keepdims=True)
    xe_sc[...] = alpha * xe_sc[...] + jax.lax.dot_general(
        x_ref[0], e, (((1,), (1,)), ((), ())),
        preferred_element_type=jnp.float32)                            # (C, 1)
    m_sc[...] = m_new

    @pl.when(k == pl.num_programs(1) - 1)
    def _():
        inv_s = pl.reciprocal(s_sc[...], approx=True)
        wz = jnp.dot(wv_w_ref[...], xe_sc[...],
                     preferred_element_type=jnp.float32) * inv_s + wv_b_ref[...]
        z = jnp.dot(wz_w_ref[...], wz,
                    preferred_element_type=jnp.float32) + wz_b_ref[...]
        mu = jnp.mean(z, axis=0, keepdims=True)
        var = jnp.mean((z - mu) ** 2, axis=0, keepdims=True)
        zn = (z - mu) * jax.lax.rsqrt(var + 1e-5)
        w_ref[0] = jax.nn.sigmoid(
            zn * ln_g_ref[...] + ln_b_ref[...]).astype(w_ref.dtype)


def _ca_apply_kernel(x_ref, w_ref, o_ref):
    o_ref[...] = (x_ref[...] * w_ref[...]).astype(o_ref.dtype)


def _channel_attention_tiled(x_bch, params, hw, thw, weight_bytes, vmem_budget):
    b, c, _ = x_bch.shape
    wv_w, wv_b, wq_w, wq_b, wz_w, wz_b, ln_g, ln_b = params

    hw_pad = _round_up(hw, thw)
    hw_valid = hw if hw_pad != hw else None
    if hw_valid is not None:
        x_bch = jnp.pad(x_bch, ((0, 0), (0, 0), (0, hw_pad - hw)))
    nhw = hw_pad // thw

    tile_bytes = c * thw * x_bch.dtype.itemsize
    vmem_limit = int(min(0.9 * vmem_budget,
                         max(32 << 20,
                             6 * tile_bytes + 2 * weight_bytes + (4 << 20))))
    cparams = pltpu.CompilerParams(
        dimension_semantics=("parallel", "arbitrary"),
        vmem_limit_bytes=vmem_limit)

    full2 = lambda arr: pl.BlockSpec(arr.shape, lambda i, k: (0,) * arr.ndim)

    # Pass 1: per-image channel weight (b, c, 1) via online softmax over HW.
    weight = pl.pallas_call(
        functools.partial(_ca_weight_kernel, hw_valid=hw_valid, thw=thw),
        out_shape=jax.ShapeDtypeStruct((b, c, 1), jnp.float32),
        grid_spec=pltpu.PrefetchScalarGridSpec(
            num_scalar_prefetch=0,
            grid=(b, nhw),
            in_specs=[
                pl.BlockSpec((1, c, thw), lambda i, k: (i, 0, k)),     # x tile
                full2(wq_w), full2(wq_b), full2(wv_w), full2(wv_b),
                full2(wz_w), full2(wz_b), full2(ln_g), full2(ln_b),
            ],
            out_specs=pl.BlockSpec((1, c, 1), lambda i, k: (i, 0, 0)),
            scratch_shapes=[pltpu.VMEM((1, 1), jnp.float32),   # running max
                            pltpu.VMEM((1, 1), jnp.float32),   # running sum
                            pltpu.VMEM((c, 1), jnp.float32)],  # pooled x.e^T
        ),
        compiler_params=cparams,
    )(x_bch, wq_w, wq_b, wv_w, wv_b, wz_w, wz_b, ln_g, ln_b)

    # Pass 2: out = weight * x, streamed tile by tile.
    out = pl.pallas_call(
        _ca_apply_kernel,
        out_shape=jax.ShapeDtypeStruct((b, c, hw_pad), x_bch.dtype),
        grid_spec=pltpu.PrefetchScalarGridSpec(
            num_scalar_prefetch=0,
            grid=(b, nhw),
            in_specs=[
                pl.BlockSpec((1, c, thw), lambda i, k: (i, 0, k)),
                pl.BlockSpec((1, c, 1), lambda i, k: (i, 0, 0)),
            ],
            out_specs=pl.BlockSpec((1, c, thw), lambda i, k: (i, 0, k)),
        ),
        compiler_params=pltpu.CompilerParams(
            dimension_semantics=("parallel", "parallel"),
            vmem_limit_bytes=vmem_limit),
    )(x_bch, weight)

    if hw_valid is not None:
        out = out[:, :, :hw]
    return out


# -----------------------------------------------------------------------------
# Public wrapper
# -----------------------------------------------------------------------------
def channel_attention(x_nchw, params, *, hw_tile=None):
    """x_nchw: (b, c, h, w) float32. Returns (b, c, h, w)."""
    b, c, h, w = x_nchw.shape
    hw = h * w
    x_bch = x_nchw.reshape(b, c, hw)            # pure reshape, no transpose

    megacore, vmem_budget = _device_info()
    dtype_bytes = x_bch.dtype.itemsize
    weight_bytes = sum(int(p.size) * p.dtype.itemsize for p in params)

    hw_pad = _round_up(hw, 128) if hw % 128 else hw
    per_img_bytes = c * hw_pad * dtype_bytes
    single_ok = (4 * per_img_bytes + 2 * weight_bytes + (8 << 20)
                 ) <= int(0.85 * vmem_budget)

    if hw_tile is None and single_ok:
        out = _channel_attention_single(x_bch, params, hw, hw_pad,
                                        per_img_bytes, weight_bytes,
                                        megacore, vmem_budget)
    else:
        thw = hw_tile if hw_tile is not None else _pick_hw_tile(c, dtype_bytes)
        out = _channel_attention_tiled(x_bch, params, hw, thw,
                                       weight_bytes, vmem_budget)
    return out.reshape(b, c, h, w)


def init_params(key, channel):
    """Synthetic parameters matching the module's __init__ shapes.

    Conv weights stored as (C_out, C_in); biases / LN params as (C, 1) columns
    so they broadcast over the lane (HW) axis inside the kernels.
    """
    c = channel
    ks = jax.random.split(key, 6)
    scale = 0.1
    wv_w = scale * jax.random.normal(ks[0], (c // 2, c), jnp.float32)
    wv_b = scale * jax.random.normal(ks[1], (c // 2, 1), jnp.float32)
    wq_w = scale * jax.random.normal(ks[2], (1, c), jnp.float32)
    wq_b = scale * jax.random.normal(ks[3], (1, 1), jnp.float32)
    wz_w = scale * jax.random.normal(ks[4], (c, c // 2), jnp.float32)
    wz_b = scale * jax.random.normal(ks[5], (c, 1), jnp.float32)
    ln_g = jnp.ones((c, 1), jnp.float32)
    ln_b = jnp.zeros((c, 1), jnp.float32)
    return (wv_w, wv_b, wq_w, wq_b, wz_w, wz_b, ln_g, ln_b)


def channel_attention_ref(x_nchw, params):
    """Pure-JAX reference mirroring the PyTorch forward (for verification)."""
    wv_w, wv_b, wq_w, wq_b, wz_w, wz_b, ln_g, ln_b = params
    b, c, h, w = x_nchw.shape
    x = x_nchw.reshape(b, c, h * w)
    wv = jnp.einsum('oc,bch->boh', wv_w, x) + wv_b        # (b, c/2, hw)
    wq = jnp.einsum('oc,bch->boh', wq_w, x) + wq_b        # (b, 1,   hw)
    p = jax.nn.softmax(wq, axis=-1)                       # softmax over spatial
    wz = jnp.einsum('bvh,bqh->bvq', wv, p)                # (b, c/2, 1)
    z = jnp.einsum('cv,bvq->bcq', wz_w, wz) + wz_b        # (b, c, 1)
    mu = jnp.mean(z, axis=1, keepdims=True)
    var = jnp.mean((z - mu) ** 2, axis=1, keepdims=True)
    zn = (z - mu) / jnp.sqrt(var + 1e-5)
    weight = jax.nn.sigmoid(zn * ln_g + ln_b)             # (b, c, 1)
    return (x * weight).reshape(b, c, h, w)


if __name__ == "__main__":
    key = jax.random.PRNGKey(0)
    k_x1, k_x2, k_x3, k_p = jax.random.split(key, 4)

    C = 32                                     # module default channel count
    params = init_params(k_p, C)
    # Approx EUP reciprocal + deferred softmax normalization introduce
    # ~1e-4-level deltas vs the exact reference; 2e-3 still flags real bugs.
    TOL = dict(atol=2e-3, rtol=1e-3)

    # 1) Base case: small batch, HW already lane-dense (16*16 = 256).
    x1 = jax.random.normal(k_x1, (2, C, 16, 16), jnp.float32)
    o1 = jax.block_until_ready(channel_attention(x1, params))
    r1 = channel_attention_ref(x1, params)
    assert o1.shape == x1.shape
    assert jnp.allclose(o1, r1, **TOL), "mismatch (base case)"

    # 2) Larger batch: exercises the fori_loop batch-packed path (bblk > 4).
    x2 = jax.random.normal(k_x2, (16, C, 16, 16), jnp.float32)
    o2 = jax.block_until_ready(channel_attention(x2, params))
    r2 = channel_attention_ref(x2, params)
    assert jnp.allclose(o2, r2, **TOL), "mismatch (batch-packed fori path)"

    # 3) Non-lane-aligned spatial size (12*12 = 144): HW padding + mask path.
    x3 = jax.random.normal(k_x3, (2, C, 12, 12), jnp.float32)
    o3 = jax.block_until_ready(channel_attention(x3, params))
    r3 = channel_attention_ref(x3, params)
    assert jnp.allclose(o3, r3, **TOL), "mismatch (padded-HW path)"

    # 4) Force the HW-tiled two-pass path (used for very large feature maps).
    o4 = jax.block_until_ready(channel_attention(x3, params, hw_tile=128))
    assert jnp.allclose(o4, r3, **TOL), "mismatch (HW-tiled two-pass path)"

    print("KERNEL_OK")
</pallas_src>

<mosaic_0001>
module attributes {stable_mosaic.version = 11 : i64} {
  func.func @_ca_single_kernel(%arg0: i32, %arg1: memref<2x32x256xf32, #tpu.memory_space<vmem>>, %arg2: memref<1x32xf32, #tpu.memory_space<vmem>>, %arg3: memref<1x1xf32, #tpu.memory_space<vmem>>, %arg4: memref<16x32xf32, #tpu.memory_space<vmem>>, %arg5: memref<16x1xf32, #tpu.memory_space<vmem>>, %arg6: memref<32x16xf32, #tpu.memory_space<vmem>>, %arg7: memref<32x1xf32, #tpu.memory_space<vmem>>, %arg8: memref<32x1xf32, #tpu.memory_space<vmem>>, %arg9: memref<32x1xf32, #tpu.memory_space<vmem>>, %arg10: memref<2x32x256xf32, #tpu.memory_space<vmem>>) attributes {dimension_semantics = [#tpu.dimension_semantics<parallel>], iteration_bounds = array<i64: 1>, scalar_prefetch = 0 : i64, scratch_operands = 0 : i64, tpu.core_type = #tpu.core_type<tc>, window_params = [{transform_indices = @transform_0, window_bounds = array<i64: 2, 32, 256>}, {pipeline_mode = #tpu.pipeline_mode<synchronous>, transform_indices = @transform_1, window_bounds = array<i64: 1, 32>}, {pipeline_mode = #tpu.pipeline_mode<synchronous>, transform_indices = @transform_2, window_bounds = array<i64: 1, 1>}, {pipeline_mode = #tpu.pipeline_mode<synchronous>, transform_indices = @transform_3, window_bounds = array<i64: 16, 32>}, {pipeline_mode = #tpu.pipeline_mode<synchronous>, transform_indices = @transform_4, window_bounds = array<i64: 16, 1>}, {pipeline_mode = #tpu.pipeline_mode<synchronous>, transform_indices = @transform_5, window_bounds = array<i64: 32, 16>}, {pipeline_mode = #tpu.pipeline_mode<synchronous>, transform_indices = @transform_6, window_bounds = array<i64: 32, 1>}, {pipeline_mode = #tpu.pipeline_mode<synchronous>, transform_indices = @transform_7, window_bounds = array<i64: 32, 1>}, {pipeline_mode = #tpu.pipeline_mode<synchronous>, transform_indices = @transform_8, window_bounds = array<i64: 32, 1>}, {transform_indices = @transform_9, window_bounds = array<i64: 2, 32, 256>}]} {
    %c0 = arith.constant 0 : index
    %c0_0 = arith.constant 0 : index
    %0 = vector.load %arg2[%c0, %c0_0] : memref<1x32xf32, #tpu.memory_space<vmem>>, vector<1x32xf32>
    %c0_1 = arith.constant 0 : index
    %c0_2 = arith.constant 0 : index
    %c0_3 = arith.constant 0 : index
    %1 = vector.load %arg1[%c0_1, %c0_2, %c0_3] : memref<2x32x256xf32, #tpu.memory_space<vmem>>, vector<1x32x256xf32>
    %2 = vector.shape_cast %1 : vector<1x32x256xf32> to vector<32x256xf32>
    %cst = arith.constant dense<0.000000e+00> : vector<1x256xf32>
    %3 = tpu.matmul %0, %2, %cst {dimension_numbers = #tpu.dot_dimension_numbers<[1], [0], [0], [1], [0, 0, 1, 1], [], []>} : vector<1x32xf32>, vector<32x256xf32>, vector<1x256xf32> -> vector<1x256xf32>
    %c0_4 = arith.constant 0 : index
    %c0_5 = arith.constant 0 : index
    %4 = vector.load %arg3[%c0_4, %c0_5] : memref<1x1xf32, #tpu.memory_space<vmem>>, vector<1x1xf32>
    %5 = vector.broadcast %4 : vector<1x1xf32> to vector<1x256xf32>
    %6 = arith.addf %3, %5 : vector<1x256xf32>
    %cst_6 = arith.constant dense<0xFF800000> : vector<1xf32>
    %7 = vector.multi_reduction <maximumf>, %6, %cst_6 [1] : vector<1x256xf32> to vector<1xf32>
    %8 = vector.shape_cast %7 : vector<1xf32> to vector<1x1xf32>
    %9 = vector.broadcast %8 : vector<1x1xf32> to vector<1x256xf32>
    %10 = arith.subf %6, %9 : vector<1x256xf32>
    %11 = math.exp %10 : vector<1x256xf32>
    %cst_7 = arith.constant dense<0.000000e+00> : vector<1xf32>
    %12 = vector.multi_reduction <add>, %11, %cst_7 [1] : vector<1x256xf32> to vector<1xf32>
    %13 = vector.shape_cast %12 : vector<1xf32> to vector<1x1xf32>
    %14 = tpu.reciprocal %13 {approx = true} : vector<1x1xf32> -> vector<1x1xf32>
    %c0_8 = arith.constant 0 : index
    %c0_9 = arith.constant 0 : index
    %c0_10 = arith.constant 0 : index
    %15 = vector.load %arg1[%c0_8, %c0_9, %c0_10] : memref<2x32x256xf32, #tpu.memory_space<vmem>>, vector<1x32x256xf32>
    %16 = vector.shape_cast %15 : vector<1x32x256xf32> to vector<32x256xf32>
    %cst_11 = arith.constant dense<0.000000e+00> : vector<32x1xf32>
    %17 = tpu.matmul %16, %11, %cst_11 {dimension_numbers = #tpu.dot_dimension_numbers<[1], [1], [0], [0], [0, 0, 1, 0], [], []>} : vector<32x256xf32>, vector<1x256xf32>, vector<32x1xf32> -> vector<32x1xf32>
    %c0_12 = arith.constant 0 : index
    %c0_13 = arith.constant 0 : index
    %18 = vector.load %arg4[%c0_12, %c0_13] : memref<16x32xf32, #tpu.memory_space<vmem>>, vector<16x32xf32>
    %cst_14 = arith.constant dense<0.000000e+00> : vector<16x1xf32>
    %19 = tpu.matmul %18, %17, %cst_14 {dimension_numbers = #tpu.dot_dimension_numbers<[1], [0], [0], [1], [0, 0, 1, 1], [], []>} : vector<16x32xf32>, vector<32x1xf32>, vector<16x1xf32> -> vector<16x1xf32>
    %20 = vector.broadcast %14 : vector<1x1xf32> to vector<16x1xf32>
    %21 = arith.mulf %19, %20 : vector<16x1xf32>
    %c0_15 = arith.constant 0 : index
    %c0_16 = arith.constant 0 : index
    %22 = vector.load %arg5[%c0_15, %c0_16] : memref<16x1xf32, #tpu.memory_space<vmem>>, vector<16x1xf32>
    %23 = arith.addf %21, %22 : vector<16x1xf32>
    %c0_17 = arith.constant 0 : index
    %c0_18 = arith.constant 0 : index
    %24 = vector.load %arg6[%c0_17, %c0_18] : memref<32x16xf32, #tpu.memory_space<vmem>>, vector<32x16xf32>
    %cst_19 = arith.constant dense<0.000000e+00> : vector<32x1xf32>
    %25 = tpu.matmul %24, %23, %cst_19 {dimension_numbers = #tpu.dot_dimension_numbers<[1], [0], [0], [1], [0, 0, 1, 1], [], []>} : vector<32x16xf32>, vector<16x1xf32>, vector<32x1xf32> -> vector<32x1xf32>
    %c0_20 = arith.constant 0 : index
    %c0_21 = arith.constant 0 : index
    %26 = vector.load %arg7[%c0_20, %c0_21] : memref<32x1xf32, #tpu.memory_space<vmem>>, vector<32x1xf32>
    %27 = arith.addf %25, %26 : vector<32x1xf32>
    %cst_22 = arith.constant dense<0.000000e+00> : vector<1xf32>
    %28 = vector.multi_reduction <add>, %27, %cst_22 [0] : vector<32x1xf32> to vector<1xf32>
    %29 = vector.shape_cast %28 : vector<1xf32> to vector<1x1xf32>
    %cst_23 = arith.constant 3.200000e+01 : f32
    %30 = vector.broadcast %cst_23 : f32 to vector<1x1xf32>
    %31 = arith.divf %29, %30 : vector<1x1xf32>
    %32 = vector.broadcast %31 : vector<1x1xf32> to vector<32x1xf32>
    %33 = arith.subf %27, %32 : vector<32x1xf32>
    %34 = arith.mulf %33, %33 : vector<32x1xf32>
    %cst_24 = arith.constant dense<0.000000e+00> : vector<1xf32>
    %35 = vector.multi_reduction <add>, %34, %cst_24 [0] : vector<32x1xf32> to vector<1xf32>
    %36 = vector.shape_cast %35 : vector<1xf32> to vector<1x1xf32>
    %cst_25 = arith.constant 3.200000e+01 : f32
    %37 = vector.broadcast %cst_25 : f32 to vector<1x1xf32>
    %38 = arith.divf %36, %37 : vector<1x1xf32>
    %39 = vector.broadcast %31 : vector<1x1xf32> to vector<32x1xf32>
    %40 = arith.subf %27, %39 : vector<32x1xf32>
    %cst_26 = arith.constant 9.99999974E-6 : f32
    %41 = vector.broadcast %cst_26 : f32 to vector<1x1xf32>
    %42 = arith.addf %38, %41 : vector<1x1xf32>
    %43 = math.rsqrt %42 : vector<1x1xf32>
    %44 = vector.broadcast %43 : vector<1x1xf32> to vector<32x1xf32>
    %45 = arith.mulf %40, %44 : vector<32x1xf32>
    %c0_27 = arith.constant 0 : index
    %c0_28 = arith.constant 0 : index
    %46 = vector.load %arg8[%c0_27, %c0_28] : memref<32x1xf32, #tpu.memory_space<vmem>>, vector<32x1xf32>
    %47 = arith.mulf %45, %46 : vector<32x1xf32>
    %c0_29 = arith.constant 0 : index
    %c0_30 = arith.constant 0 : index
    %48 = vector.load %arg9[%c0_29, %c0_30] : memref<32x1xf32, #tpu.memory_space<vmem>>, vector<32x1xf32>
    %49 = arith.addf %47, %48 : vector<32x1xf32>
    %50 = arith.negf %49 : vector<32x1xf32>
    %51 = math.exp %50 : vector<32x1xf32>
    %cst_31 = arith.constant 1.000000e+00 : f32
    %52 = vector.broadcast %cst_31 : f32 to vector<32x1xf32>
    %53 = arith.addf %52, %51 : vector<32x1xf32>
    %54 = arith.divf %52, %53 : vector<32x1xf32>
    %c0_32 = arith.constant 0 : index
    %c0_33 = arith.constant 0 : index
    %c0_34 = arith.constant 0 : index
    %55 = vector.load %arg1[%c0_32, %c0_33, %c0_34] : memref<2x32x256xf32, #tpu.memory_space<vmem>>, vector<1x32x256xf32>
    %56 = vector.shape_cast %55 : vector<1x32x256xf32> to vector<32x256xf32>
    %57 = vector.broadcast %54 : vector<32x1xf32> to vector<32x256xf32>
    %58 = arith.mulf %56, %57 : vector<32x256xf32>
    %c0_35 = arith.constant 0 : index
    %c0_36 = arith.constant 0 : index
    %c0_37 = arith.constant 0 : index
    %59 = vector.load %arg10[%c0_35, %c0_36, %c0_37] : memref<2x32x256xf32, #tpu.memory_space<vmem>>, vector<1x32x256xf32>
    %60 = vector.shape_cast %59 : vector<1x32x256xf32> to vector<32x256xf32>
    %61 = vector.shape_cast %58 : vector<32x256xf32> to vector<1x32x256xf32>
    tpu.vector_store %arg10[%c0_35, %c0_36, %c0_37], %61 {strides = array<i32>} : memref<2x32x256xf32, #tpu.memory_space<vmem>>, vector<1x32x256xf32>,
    %c0_38 = arith.constant 0 : index
    %c0_39 = arith.constant 0 : index
    %62 = vector.load %arg2[%c0_38, %c0_39] : memref<1x32xf32, #tpu.memory_space<vmem>>, vector<1x32xf32>
    %c1 = arith.constant 1 : index
    %c0_40 = arith.constant 0 : index
    %c0_41 = arith.constant 0 : index
    %63 = vector.load %arg1[%c1, %c0_40, %c0_41] : memref<2x32x256xf32, #tpu.memory_space<vmem>>, vector<1x32x256xf32>
    %64 = vector.shape_cast %63 : vector<1x32x256xf32> to vector<32x256xf32>
    %cst_42 = arith.constant dense<0.000000e+00> : vector<1x256xf32>
    %65 = tpu.matmul %62, %64, %cst_42 {dimension_numbers = #tpu.dot_dimension_numbers<[1], [0], [0], [1], [0, 0, 1, 1], [], []>} : vector<1x32xf32>, vector<32x256xf32>, vector<1x256xf32> -> vector<1x256xf32>
    %c0_43 = arith.constant 0 : index
    %c0_44 = arith.constant 0 : index
    %66 = vector.load %arg3[%c0_43, %c0_44] : memref<1x1xf32, #tpu.memory_space<vmem>>, vector<1x1xf32>
    %67 = vector.broadcast %66 : vector<1x1xf32> to vector<1x256xf32>
    %68 = arith.addf %65, %67 : vector<1x256xf32>
    %cst_45 = arith.constant dense<0xFF800000> : vector<1xf32>
    %69 = vector.multi_reduction <maximumf>, %68, %cst_45 [1] : vector<1x256xf32> to vector<1xf32>
    %70 = vector.shape_cast %69 : vector<1xf32> to vector<1x1xf32>
    %71 = vector.broadcast %70 : vector<1x1xf32> to vector<1x256xf32>
    %72 = arith.subf %68, %71 : vector<1x256xf32>
    %73 = math.exp %72 : vector<1x256xf32>
    %cst_46 = arith.constant dense<0.000000e+00> : vector<1xf32>
    %74 = vector.multi_reduction <add>, %73, %cst_46 [1] : vector<1x256xf32> to vector<1xf32>
    %75 = vector.shape_cast %74 : vector<1xf32> to vector<1x1xf32>
    %76 = tpu.reciprocal %75 {approx = true} : vector<1x1xf32> -> vector<1x1xf32>
    %c1_47 = arith.constant 1 : index
    %c0_48 = arith.constant 0 : index
    %c0_49 = arith.constant 0 : index
    %77 = vector.load %arg1[%c1_47, %c0_48, %c0_49] : memref<2x32x256xf32, #tpu.memory_space<vmem>>, vector<1x32x256xf32>
    %78 = vector.shape_cast %77 : vector<1x32x256xf32> to vector<32x256xf32>
    %cst_50 = arith.constant dense<0.000000e+00> : vector<32x1xf32>
    %79 = tpu.matmul %78, %73, %cst_50 {dimension_numbers = #tpu.dot_dimension_numbers<[1], [1], [0], [0], [0, 0, 1, 0], [], []>} : vector<32x256xf32>, vector<1x256xf32>, vector<32x1xf32> -> vector<32x1xf32>
    %c0_51 = arith.constant 0 : index
    %c0_52 = arith.constant 0 : index
    %80 = vector.load %arg4[%c0_51, %c0_52] : memref<16x32xf32, #tpu.memory_space<vmem>>, vector<16x32xf32>
    %cst_53 = arith.constant dense<0.000000e+00> : vector<16x1xf32>
    %81 = tpu.matmul %80, %79, %cst_53 {dimension_numbers = #tpu.dot_dimension_numbers<[1], [0], [0], [1], [0, 0, 1, 1], [], []>} : vector<16x32xf32>, vector<32x1xf32>, vector<16x1xf32> -> vector<16x1xf32>
    %82 = vector.broadcast %76 : vector<1x1xf32> to vector<16x1xf32>
    %83 = arith.mulf %81, %82 : vector<16x1xf32>
    %c0_54 = arith.constant 0 : index
    %c0_55 = arith.constant 0 : index
    %84 = vector.load %arg5[%c0_54, %c0_55] : memref<16x1xf32, #tpu.memory_space<vmem>>, vector<16x1xf32>
    %85 = arith.addf %83, %84 : vector<16x1xf32>
    %c0_56 = arith.constant 0 : index
    %c0_57 = arith.constant 0 : index
    %86 = vector.load %arg6[%c0_56, %c0_57] : memref<32x16xf32, #tpu.memory_space<vmem>>, vector<32x16xf32>
    %cst_58 = arith.constant dense<0.000000e+00> : vector<32x1xf32>
    %87 = tpu.matmul %86, %85, %cst_58 {dimension_numbers = #tpu.dot_dimension_numbers<[1], [0], [0], [1], [0, 0, 1, 1], [], []>} : vector<32x16xf32>, vector<16x1xf32>, vector<32x1xf32> -> vector<32x1xf32>
    %c0_59 = arith.constant 0 : index
    %c0_60 = arith.constant 0 : index
    %88 = vector.load %arg7[%c0_59, %c0_60] : memref<32x1xf32, #tpu.memory_space<vmem>>, vector<32x1xf32>
    %89 = arith.addf %87, %88 : vector<32x1xf32>
    %cst_61 = arith.constant dense<0.000000e+00> : vector<1xf32>
    %90 = vector.multi_reduction <add>, %89, %cst_61 [0] : vector<32x1xf32> to vector<1xf32>
    %91 = vector.shape_cast %90 : vector<1xf32> to vector<1x1xf32>
    %cst_62 = arith.constant 3.200000e+01 : f32
    %92 = vector.broadcast %cst_62 : f32 to vector<1x1xf32>
    %93 = arith.divf %91, %92 : vector<1x1xf32>
    %94 = vector.broadcast %93 : vector<1x1xf32> to vector<32x1xf32>
    %95 = arith.subf %89, %94 : vector<32x1xf32>
    %96 = arith.mulf %95, %95 : vector<32x1xf32>
    %cst_63 = arith.constant dense<0.000000e+00> : vector<1xf32>
    %97 = vector.multi_reduction <add>, %96, %cst_63 [0] : vector<32x1xf32> to vector<1xf32>
    %98 = vector.shape_cast %97 : vector<1xf32> to vector<1x1xf32>
    %cst_64 = arith.constant 3.200000e+01 : f32
    %99 = vector.broadcast %cst_64 : f32 to vector<1x1xf32>
    %100 = arith.divf %98, %99 : vector<1x1xf32>
    %101 = vector.broadcast %93 : vector<1x1xf32> to vector<32x1xf32>
    %102 = arith.subf %89, %101 : vector<32x1xf32>
    %cst_65 = arith.constant 9.99999974E-6 : f32
    %103 = vector.broadcast %cst_65 : f32 to vector<1x1xf32>
    %104 = arith.addf %100, %103 : vector<1x1xf32>
    %105 = math.rsqrt %104 : vector<1x1xf32>
    %106 = vector.broadcast %105 : vector<1x1xf32> to vector<32x1xf32>
    %107 = arith.mulf %102, %106 : vector<32x1xf32>
    %c0_66 = arith.constant 0 : index
    %c0_67 = arith.constant 0 : index
    %108 = vector.load %arg8[%c0_66, %c0_67] : memref<32x1xf32, #tpu.memory_space<vmem>>, vector<32x1xf32>
    %109 = arith.mulf %107, %108 : vector<32x1xf32>
    %c0_68 = arith.constant 0 : index
    %c0_69 = arith.constant 0 : index
    %110 = vector.load %arg9[%c0_68, %c0_69] : memref<32x1xf32, #tpu.memory_space<vmem>>, vector<32x1xf32>
    %111 = arith.addf %109, %110 : vector<32x1xf32>
    %112 = arith.negf %111 : vector<32x1xf32>
    %113 = math.exp %112 : vector<32x1xf32>
    %cst_70 = arith.constant 1.000000e+00 : f32
    %114 = vector.broadcast %cst_70 : f32 to vector<32x1xf32>
    %115 = arith.addf %114, %113 : vector<32x1xf32>
    %116 = arith.divf %114, %115 : vector<32x1xf32>
    %c1_71 = arith.constant 1 : index
    %c0_72 = arith.constant 0 : index
    %c0_73 = arith.constant 0 : index
    %117 = vector.load %arg1[%c1_71, %c0_72, %c0_73] : memref<2x32x256xf32, #tpu.memory_space<vmem>>, vector<1x32x256xf32>
    %118 = vector.shape_cast %117 : vector<1x32x256xf32> to vector<32x256xf32>
    %119 = vector.broadcast %116 : vector<32x1xf32> to vector<32x256xf32>
    %120 = arith.mulf %118, %119 : vector<32x256xf32>
    %c1_74 = arith.constant 1 : index
    %c0_75 = arith.constant 0 : index
    %c0_76 = arith.constant 0 : index
    %121 = vector.load %arg10[%c1_74, %c0_75, %c0_76] : memref<2x32x256xf32, #tpu.memory_space<vmem>>, vector<1x32x256xf32>
    %122 = vector.shape_cast %121 : vector<1x32x256xf32> to vector<32x256xf32>
    %123 = vector.shape_cast %120 : vector<32x256xf32> to vector<1x32x256xf32>
    tpu.vector_store %arg10[%c1_74, %c0_75, %c0_76], %123 {strides = array<i32>} : memref<2x32x256xf32, #tpu.memory_space<vmem>>, vector<1x32x256xf32>,
    return
  }
  func.func @transform_0(%arg0: i32) -> (i32, i32, i32) {
    %c0_i32 = arith.constant 0 : i32
    %c0_i32_0 = arith.constant 0 : i32
    %c0_i32_1 = arith.constant 0 : i32
    return %arg0, %c0_i32, %c0_i32_0 : i32, i32, i32
  }
  func.func @transform_1(%arg0: i32) -> (i32, i32) {
    %c0_i32 = arith.constant 0 : i32
    %c0_i32_0 = arith.constant 0 : i32
    %c0_i32_1 = arith.constant 0 : i32
    return %c0_i32, %c0_i32_0 : i32, i32
  }
  func.func @transform_2(%arg0: i32) -> (i32, i32) {
    %c0_i32 = arith.constant 0 : i32
    %c0_i32_0 = arith.constant 0 : i32
    %c0_i32_1 = arith.constant 0 : i32
    return %c0_i32, %c0_i32_0 : i32, i32
  }
  func.func @transform_3(%arg0: i32) -> (i32, i32) {
    %c0_i32 = arith.constant 0 : i32
    %c0_i32_0 = arith.constant 0 : i32
    %c0_i32_1 = arith.constant 0 : i32
    return %c0_i32, %c0_i32_0 : i32, i32
  }
  func.func @transform_4(%arg0: i32) -> (i32, i32) {
    %c0_i32 = arith.constant 0 : i32
    %c0_i32_0 = arith.constant 0 : i32
    %c0_i32_1 = arith.constant 0 : i32
    return %c0_i32, %c0_i32_0 : i32, i32
  }
  func.func @transform_5(%arg0: i32) -> (i32, i32) {
    %c0_i32 = arith.constant 0 : i32
    %c0_i32_0 = arith.constant 0 : i32
    %c0_i32_1 = arith.constant 0 : i32
    return %c0_i32, %c0_i32_0 : i32, i32
  }
  func.func @transform_6(%arg0: i32) -> (i32, i32) {
    %c0_i32 = arith.constant 0 : i32
    %c0_i32_0 = arith.constant 0 : i32
    %c0_i32_1 = arith.constant 0 : i32
    return %c0_i32, %c0_i32_0 : i32, i32
  }
  func.func @transform_7(%arg0: i32) -> (i32, i32) {
    %c0_i32 = arith.constant 0 : i32
    %c0_i32_0 = arith.constant 0 : i32
    %c0_i32_1 = arith.constant 0 : i32
    return %c0_i32, %c0_i32_0 : i32, i32
  }
  func.func @transform_8(%arg0: i32) -> (i32, i32) {
    %c0_i32 = arith.constant 0 : i32
    %c0_i32_0 = arith.constant 0 : i32
    %c0_i32_1 = arith.constant 0 : i32
    return %c0_i32, %c0_i32_0 : i32, i32
  }
  func.func @transform_9(%arg0: i32) -> (i32, i32, i32) {
    %c0_i32 = arith.constant 0 : i32
    %c0_i32_0 = arith.constant 0 : i32
    %c0_i32_1 = arith.constant 0 : i32
    return %arg0, %c0_i32, %c0_i32_0 : i32, i32, i32
  }
}

</mosaic_0001>

<bundles_post_ra>
// kernel: tpu_custom_call.1
= control target key start
LH: loop header
LB: loop body
LE: loop exit
PB: predicated region body
PF: predicated region fallthrough
CT: control target
= control target key end

     0   :  { %s1348_s0 = inlined_call_operand.hbm [shape: f32[2,32,256], index: 0, kind: input, shape index: {}]   ;;  %s1349_s1 = inlined_call_operand.vmem [shape: f32[1,32], index: 1, kind: input, shape index: {}]   ;;  %s1350_s2 = inlined_call_operand.<no memory space> [shape: f32[1,1], index: 2, kind: input, shape index: {}]   ;;  %s1351_s3 = inlined_call_operand.vmem [shape: f32[16,32], index: 3, kind: input, shape index: {}]   ;;  %s1352_s4 = inlined_call_operand.vmem [shape: f32[16,1], index: 4, kind: input, shape index: {}]   ;;  %s1353_s5 = inlined_call_operand.vmem [shape: f32[32,16], index: 5, kind: input, shape index: {}]   ;;  %s1354_s6 = inlined_call_operand.vmem [shape: f32[32,1], index: 6, kind: input, shape index: {}]   ;;  %s1355_s7 = inlined_call_operand.vmem [shape: f32[32,1], index: 7, kind: input, shape index: {}]   ;;  %s1356_s8 = inlined_call_operand.vmem [shape: f32[32,1], index: 8, kind: input, shape index: {}]   ;;  %s1357_s9 = inlined_call_operand.hbm [shape: f32[2,32,256], index: 9, kind: output, shape index: {}]  }
   0x1   :  { %v14_v0 = vstv %s1350_s2 }
   0x2   :  { %15 = vst [vmem:[#allocation2] sm:$0x1] %v14_v0 }
   0x3   :  { %16 = vsyncpa [#allocation4], 0 }
   0x4   :  { %17 = vsyncpa [#allocation5], 0  ;;  %s22_s13 = sshll.u32 %s1348_s0, 4  ;;  %s956_s14 = smov [#allocation3]   ;;  %s23_s13 = int_to_ptr.hbm [resolvable:$true] %s22_s13 }
   0x5   :  { %s24_s15 = sshll.u32 %s956_s14, 4  ;;  %s957_s16 = smov 256   ;;  %s25_s15 = int_to_ptr.vmem [resolvable:$true] %s24_s15 }
   0x6   :  { %s958_s17 = smov 16  }
   0x7   :  { %30 = dma.hbm_to_vmem [thread:$0]  %s23_s13, 2048, %s25_s15, [#allocation4], %s957_s16, %s957_s16, %s958_s17  }
   0x8   :  { %952 = dma.done.wait [#allocation4], 2048  }
   0x9   :  { %953 = vsyncadd [#allocation4], 4294965248  ;;  %v959_v1 = vmov 0   ;;  %v1021_v2 = vld [vmem:[#allocation3 + $0x30] sm:$0xff]  ;;  %v1023_v3 = vld [vmem:[#allocation3 + $0x38] sm:$0xff]  ;;  %vm67_vm0 = vcmask 261120  }
   0xa   :  { %843 = vset.pattern.permute.xlu0 %v959_v1  ;;  %844 = vset.pattern.permute.xlu2 %v959_v1  ;;  %v1025_v4 = vld [vmem:[#allocation3 + $0x20] sm:$0xff]  ;;  %v1029_v5 = vld [vmem:[#allocation3 + $0x28] sm:$0xff]  ;;  %v1031_v6 = vld [vmem:[#allocation3 + $0x10] sm:$0xff]  ;;  %vm111_vm1 = vcmask 1040384   ;;  %vm197_vm2 = vcmask 130048   ;;  %vm239_vm3 = vcmask 7168  }
   0xb   :  { %845 = vset.pattern.permute.xlu1 %v959_v1  ;;  %83 = vmatpush.msra.mxu0 %v1021_v2  ;;  %v1033_v7 = vld [vmem:[#allocation3 + $0x18] sm:$0xff]  ;;  %v1037_v9 = vld [vmem:[#allocation3] sm:$0xff]  ;;  %v1039_v10 = vld [vmem:[#allocation3 + $0x8] sm:$0xff]  ;;  %s798_s12 = sshll.u32 %s1357_s9, 4  ;;  %s799_s12 = int_to_ptr.hbm [resolvable:$true] %s798_s12 }
   0xc   :  { %103 = vmatpush.msra.mxu1 %v1023_v3  ;;  %v60_v8 = vld [vmem:[#allocation2] sm:$0x1]  ;;  %v1046_v12 = vld [vmem:[#allocation3 + $0x70] sm:$0xff]  ;;  %v1054_v14 = vld [vmem:[#allocation3 + $0x60] sm:$0xff] }
   0xd   :  { %84 = vmatpush.msra.mxu0 %v1025_v4  ;;  %63 = vperm.xlu0 %843, %v60_v8   ;;  %v51_v11 = vld [vmem:[%s1349_s1] sm:$0x1]  ;;  %v1056_v15 = vld [vmem:[#allocation3 + $0x68] sm:$0xff]  ;;  %v1060_v17 = vld [vmem:[#allocation3 + $0x50] sm:$0xff] }
   0xe   :  { %104 = vmatpush.msra.mxu1 %v1029_v5  ;;  %v1048_v13 = vld [vmem:[#allocation3 + $0x78] sm:$0xff]  ;;  %v1066_v19 = vld [vmem:[#allocation3 + $0x40] sm:$0xff]  ;;  %v1068_v20 = vld [vmem:[#allocation3 + $0x48] sm:$0xff] }
   0xf   :  { %85 = vmatpush.msra.mxu0 %v1031_v6  ;;  %v436_v16 = vld [vmem:[#allocation2] sm:$0x1] }
  0x10   :  { %105 = vmatpush.msra.mxu1 %v1033_v7  ;;  %v1062_v18 = vld [vmem:[#allocation3 + $0x58] sm:$0xff] }
  0x11   :  { %86 = vmatpush.msra.mxu0 %v1037_v9  ;;  %v426_v21 = vld [vmem:[%s1349_s1] sm:$0x1] }
  0x12   :  { %106 = vmatpush.msra.mxu1 %v1039_v10  ;;  %811 = vmatmul.msk.f32.vlgmr.msra.gmra.mxu0 %vm67_vm0, %v51_v11 }
  0x13   :  { %812 = vmatmul.msk.f32.vlgmr.msra.gmra.mxu1 %vm67_vm0, %v51_v11  ;;  %458 = vmatpush.msrb.mxu0 %v1046_v12 }
  0x14   :  { %478 = vmatpush.msrb.mxu1 %v1048_v13 }
  0x15   :  { %459 = vmatpush.msrb.mxu0 %v1054_v14  ;;  %439 = vperm.xlu0 %843, %v436_v16  }
  0x16   :  { %479 = vmatpush.msrb.mxu1 %v1056_v15 }
  0x17   :  { %460 = vmatpush.msrb.mxu0 %v1060_v17 }
  0x18   :  { %480 = vmatpush.msrb.mxu1 %v1062_v18 }
  0x19   :  { %461 = vmatpush.msrb.mxu0 %v1066_v19 }
  0x1a   :  { %481 = vmatpush.msrb.mxu1 %v1068_v20  ;;  %823 = vmatmul.msk.f32.vlgmr.msrb.gmra.mxu0 %vm67_vm0, %v426_v21 }
  0x1b   :  { %824 = vmatmul.msk.f32.vlgmr.msrb.gmra.mxu1 %vm67_vm0, %v426_v21 }
  0x7f   :  { %v64_v22 = vpop.permute.xlu0 %63 }
  0x80   :  { %v66_v23 = vperm.slane %v64_v22, 0 }
  0x87   :  { %v440_v30 = vpop.permute.xlu0 %439 }
  0x88   :  { %v442_v32 = vperm.slane %v440_v30, 0 }
  0x8f   :  { %v88_v24 = vpop.f32.mrf.mxu0 }
  0x90   :  { %v108_v25 = vpop.f32.mrf.mxu1  ;;  %v89_v26 = vadd.f32 %v88_v24, %v66_v23 }
  0x91   :  { %v109_v27 = vadd.f32 %v108_v25, %v66_v23 }
  0x92   :  { %v112_v28 = vsel %vm111_vm1, %v89_v26, -inf }
  0x93   :  { %v113_v29 = vsel %vm111_vm1, %v109_v27, -inf }
  0x94   :  { %v114_v31 = vmax.f32 %v112_v28, %v113_v29 }
  0x96   :  { %115 = vmax.xlane.f32.xlu1 %v114_v31 }
  0x97   :  { %v463_v33 = vpop.f32.mrf.mxu0 }
  0x98   :  { %v483_v34 = vpop.f32.mrf.mxu1  ;;  %v464_v35 = vadd.f32 %v463_v33, %v442_v32 }
  0x99   :  { %v484_v36 = vadd.f32 %v483_v34, %v442_v32 }
  0x9a   :  { %v486_v37 = vsel %vm111_vm1, %v464_v35, -inf }
  0x9b   :  { %v487_v38 = vsel %vm111_vm1, %v484_v36, -inf }
  0x9c   :  { %v488_v39 = vmax.f32 %v486_v37, %v487_v38 }
  0x9e   :  { %489 = vmax.xlane.f32.xlu1 %v488_v39  ;;  %v152_v39 = vld [vmem:[%s1351_s3 + $0x8] sm:$0xff] }
 0x109   :  { %v116_v40 = vpop.xlane.xlu1 %115 }
 0x10a   :  { %v117_v41 = vsub.f32 %v89_v26, %v116_v40  ;;  %v118_v42 = vsub.f32 %v109_v27, %v116_v40 }
 0x10c   :  { %v119_v43 = vmul.f32 1.442695, %v117_v41  ;;  %v121_v44 = vmul.f32 1.442695, %v118_v42 }
 0x10e   :  { %846 = vpow2.f32 %v119_v43 }
 0x10f   :  { %848 = vpow2.f32 %v121_v44 }
 0x111   :  { %v490_v45 = vpop.xlane.xlu1 %489 }
 0x112   :  { %v491_v46 = vsub.f32 %v464_v35, %v490_v45  ;;  %v492_v47 = vsub.f32 %v484_v36, %v490_v45  ;;  %v151_v36 = vld [vmem:[%s1351_s3] sm:$0xff] }
 0x114   :  { %v847_v48 = vpop.eup %846  ;;  %v493_v49 = vmul.f32 1.442695, %v491_v46  ;;  %v495_v50 = vmul.f32 1.442695, %v492_v47 }
 0x115   :  { %v849_v51 = vpop.eup %848  ;;  %v129_v52 = vperm.slane %v847_v48, 0  ;;  %v123_v29 = vsel %vm111_vm1, %v847_v48, 0.0 }
 0x116   :  { %v130_v53 = vperm.slane %v849_v51, 0  ;;  %850 = vpow2.f32 %v493_v49  ;;  %v124_v30 = vsel %vm111_vm1, %v849_v51, 0.0  ;;  %v186_v49 = vld [vmem:[%s1352_s4 + $0x8] sm:$0xff] }
 0x117   :  { %852 = vpow2.f32 %v495_v50  ;;  %v137_v54 = vmul.f32 %v129_v52, %v1021_v2  ;;  %v133_v55 = vmul.f32 %v129_v52, %v1031_v6  ;;  %v131_v56 = vmul.f32 %v129_v52, %v1037_v9 }
 0x118   :  { %v138_v57 = vmul.f32 %v130_v53, %v1023_v3  ;;  %v134_v58 = vmul.f32 %v130_v53, %v1033_v7  ;;  %v132_v59 = vmul.f32 %v130_v53, %v1039_v10  ;;  %v135_v6 = vmul.f32 %v129_v52, %v1025_v4  ;;  %v559_v52 = vld [vmem:[%s1352_s4] sm:$0xff] }
 0x119   :  { %v136_v8 = vmul.f32 %v130_v53, %v1029_v5  ;;  %v125_v31 = vadd.f32 %v124_v30, %v123_v29 }
 0x11a   :  { %v148_v60 = vadd.f32 %v138_v57, %v137_v54  ;;  %v142_v61 = vadd.f32 %v134_v58, %v133_v55  ;;  %v139_v62 = vadd.f32 %v132_v59, %v131_v56  ;;  %v189_v56 = vld [vmem:[%s1353_s5] sm:$0xff] }
 0x11b   :  { %v145_v11 = vadd.f32 %v136_v8, %v135_v6  ;;  %v960_v8 = vmov 32.0  }
 0x11c   :  { %v851_v63 = vpop.eup %850  ;;  %149 = vadd.xlane.f32.xlu2 %v148_v60  ;;  %143 = vadd.xlane.f32.xlu0 %v142_v61 }
 0x11d   :  { %v853_v0 = vpop.eup %852  ;;  %v503_v1 = vperm.slane %v851_v63, 0  ;;  %140 = vadd.xlane.f32.xlu1 %v139_v62 }
 0x11e   :  { %v504_v2 = vperm.slane %v853_v0, 0  ;;  %v498_v26 = vsel %vm111_vm1, %v853_v0, 0.0  ;;  %v565_v0 = vld [vmem:[%s1353_s5 + $0x10] sm:$0xff] }
 0x11f   :  { %v509_v3 = vmul.f32 %v503_v1, %v1054_v14  ;;  %v511_v21 = vmul.f32 %v503_v1, %v1046_v12  ;;  %v505_v23 = vmul.f32 %v503_v1, %v1066_v19  ;;  %v507_v5 = vmul.f32 %v503_v1, %v1060_v17  ;;  %v566_v1 = vld [vmem:[%s1353_s5 + $0x18] sm:$0xff] }
 0x120   :  { %v510_v7 = vmul.f32 %v504_v2, %v1056_v15  ;;  %v512_v22 = vmul.f32 %v504_v2, %v1048_v13  ;;  %v506_v24 = vmul.f32 %v504_v2, %v1068_v20  ;;  %v508_v14 = vmul.f32 %v504_v2, %v1062_v18 }
 0x121   :  { %v497_v15 = vsel %vm111_vm1, %v851_v63, 0.0  ;;  %v190_v63 = vld [vmem:[%s1353_s5 + $0x8] sm:$0xff] }
 0x122   :  { %v519_v16 = vadd.f32 %v510_v7, %v509_v3  ;;  %v522_v25 = vadd.f32 %v512_v22, %v511_v21  ;;  %v513_v4 = vadd.f32 %v506_v24, %v505_v23  ;;  %v516_v27 = vadd.f32 %v508_v14, %v507_v5  ;;  %v193_v3 = vld [vmem:[%s1354_s6] sm:$0xff]  ;;  %v569_v7 = vld [vmem:[%s1354_s6 + $0x10] sm:$0xff]  ;;  %v194_v23 = vld [vmem:[%s1354_s6 + $0x8] sm:$0xff] }
 0x123   :  { %v499_v28 = vadd.f32 %v498_v26, %v497_v15  ;;  %v570_v26 = vld [vmem:[%s1354_s6 + $0x18] sm:$0xff] }
 0x124   :  { %146 = vadd.xlane.f32.xlu2 %v145_v11 }
 0x125   :  { %520 = vadd.xlane.f32.xlu1 %v519_v16 }
 0x12c   :  { %523 = vadd.xlane.f32.xlu2 %v522_v25 }
 0x12d   :  { %514 = vadd.xlane.f32.xlu1 %v513_v4 }
 0x134   :  { %517 = vadd.xlane.f32.xlu2 %v516_v27 }
 0x135   :  { %500 = vadd.xlane.f32.xlu1 %v499_v28 }
 0x13c   :  { %126 = vadd.xlane.f32.xlu2 %v125_v31 }
 0x18f   :  { %v150_v32 = vpop.xlane.xlu2 %149  ;;  %v144_v35 = vpop.xlane.xlu0 %143 }
 0x190   :  { %171 = vmatpush.msra.mxu2 %v150_v32  ;;  %v141_v33 = vpop.xlane.xlu1 %140 }
 0x197   :  { %v147_v34 = vpop.xlane.xlu2 %146 }
 0x198   :  { %172 = vmatpush.msra.mxu2 %v147_v34  ;;  %v521_v37 = vpop.xlane.xlu1 %520 }
 0x19a   :  { %173 = vmatpush.msra.mxu2 %v144_v35 }
 0x19c   :  { %174 = vmatpush.msra.mxu2 %v141_v33 }
 0x19d   :  { %813 = vmatmul.msk.f32.vlgmr.msra.gmra.mxu2 %vm67_vm0, %v151_v36 }
 0x19f   :  { %v524_v38 = vpop.xlane.xlu2 %523 }
 0x1a0   :  { %545 = vmatpush.msra.mxu0 %v524_v38  ;;  %v515_v41 = vpop.xlane.xlu1 %514 }
 0x1a2   :  { %546 = vmatpush.msra.mxu0 %v521_v37 }
 0x1a5   :  { %814 = vmatmul.msk.f32.gmra.mxu2 %vm67_vm0, %v152_v39 }
 0x1a7   :  { %v518_v40 = vpop.xlane.xlu2 %517 }
 0x1a8   :  { %547 = vmatpush.msra.mxu0 %v518_v40  ;;  %v501_v44 = vpop.xlane.xlu1 %500 }
 0x1aa   :  { %548 = vmatpush.msra.mxu0 %v515_v41 }
 0x1ab   :  { %825 = vmatmul.msk.f32.vlgmr.msra.gmra.mxu0 %vm67_vm0, %v151_v36 }
 0x1af   :  { %v127_v42 = vpop.xlane.xlu2 %126 }
 0x1b0   :  { %854 = vrcp.f32 %v127_v42 }
 0x1b1   :  { %856 = vrcp.f32 %v501_v44 }
 0x1b2   :  { %858 = vrcp.f32 %v960_v8 }
 0x1b3   :  { %826 = vmatmul.msk.f32.gmra.mxu0 %vm67_vm0, %v152_v39 }
 0x1b6   :  { %v855_v45 = vpop.eup %854 }
 0x1b7   :  { %v182_v46 = vperm.slane %v855_v45, 0  ;;  %v857_v54 = vpop.eup %856 }
 0x1b8   :  { %v556_v57 = vperm.slane %v857_v54, 0  ;;  %v859_v25 = vpop.eup %858 }
 0x1b9   :  { %v254_v28 = vmul.f32 32.0, %v859_v25  ;;  %vm258_vm4 = vweird.f32 %v859_v25 }
 0x1bb   :  { %v255_v36 = vsub.f32 1.0, %v254_v28 }
 0x220   :  { %v176_v43 = vpop.f32.mrf.mxu2 }
 0x221   :  { %v183_v50 = vmul.f32 %v182_v46, %v176_v43  ;;  %v256_v43 = vmul.f32 %v859_v25, %v255_v36 }
 0x223   :  { %v187_v55 = vadd.f32 %v559_v52, %v183_v50  ;;  %v257_v50 = vadd.f32 %v859_v25, %v256_v43 }
 0x228   :  { %v179_v47 = vpop.f32.mrf.mxu2  ;;  %v550_v48 = vpop.f32.mrf.mxu0 }
 0x229   :  { %v184_v51 = vmul.f32 %v182_v46, %v179_v47  ;;  %v557_v59 = vmul.f32 %v556_v57, %v550_v48 }
 0x22b   :  { %v188_v53 = vadd.f32 %v186_v49, %v184_v51  ;;  %v561_v62 = vadd.f32 %v559_v52, %v557_v59 }
 0x22d   :  { %224 = vmatpush.msra.mxu3 %v188_v53 }
 0x22f   :  { %225 = vmatpush.msra.mxu3 %v187_v55 }
 0x230   :  { %815 = vmatmul.msk.f32.vlgmr.msra.gmra.mxu3 %vm197_vm2, %v189_v56  ;;  %v553_v58 = vpop.f32.mrf.mxu0 }
 0x231   :  { %v558_v60 = vmul.f32 %v556_v57, %v553_v58 }
 0x233   :  { %v562_v61 = vadd.f32 %v558_v60, %v186_v49 }
 0x235   :  { %597 = vmatpush.msra.mxu1 %v562_v61  ;;  %835 = vmatpush.msrb.mxu2 %v562_v61 }
 0x237   :  { %598 = vmatpush.msra.mxu1 %v561_v62  ;;  %836 = vmatpush.msrb.mxu2 %v561_v62 }
 0x238   :  { %816 = vmatmul.msk.f32.gmra.mxu3 %vm197_vm2, %v190_v63  ;;  %829 = vmatmul.msk.f32.vlgmr.msrb.gmra.mxu2 %vm197_vm2, %v565_v0 }
 0x239   :  { %827 = vmatmul.msk.f32.vlgmr.msra.gmra.mxu1 %vm197_vm2, %v189_v56  ;;  %v259_v56 = vsel %vm258_vm4, %v859_v25, %v257_v50 }
 0x240   :  { %817 = vmatmul.msk.f32.gmra.mxu3 %vm197_vm2, %v565_v0  ;;  %830 = vmatmul.msk.f32.gmra.mxu2 %vm197_vm2, %v566_v1 }
 0x241   :  { %828 = vmatmul.msk.f32.gmra.mxu1 %vm197_vm2, %v190_v63 }
 0x248   :  { %818 = vmatmul.msk.f32.gmra.mxu3 %vm197_vm2, %v566_v1 }
 0x2b3   :  { %v227_v2 = vpop.f32.mrf.mxu3 }
 0x2b4   :  { %v228_v34 = vadd.f32 %v227_v2, %v193_v3 }
 0x2b6   :  { %v600_v6 = vpop.f32.mrf.mxu1  ;;  %v240_v41 = vsel %vm239_vm3, %v228_v34, 0.0 }
 0x2b7   :  { %v601_v11 = vadd.f32 %v600_v6, %v193_v3 }
 0x2b9   :  { %v612_v4 = vsel %vm239_vm3, %v601_v11, 0.0 }
 0x2bb   :  { %v230_v16 = vpop.f32.mrf.mxu3  ;;  %v606_v21 = vpop.f32.mrf.mxu2 }
 0x2bc   :  { %v607_v22 = vadd.f32 %v606_v21, %v569_v7  ;;  %v231_v31 = vadd.f32 %v230_v16, %v194_v23 }
 0x2be   :  { %v603_v24 = vpop.f32.mrf.mxu1  ;;  %v615_v14 = vsel %vm239_vm3, %v607_v22, 0.0  ;;  %v241_v39 = vsel %vm239_vm3, %v231_v31, 0.0 }
 0x2bf   :  { %v604_v5 = vadd.f32 %v603_v24, %v194_v23  ;;  %v242_v44 = vadd.f32 %v241_v39, %v240_v41 }
 0x2c1   :  { %v613_v15 = vsel %vm239_vm3, %v604_v5, 0.0 }
 0x2c2   :  { %v614_v27 = vadd.f32 %v613_v15, %v612_v4 }
 0x2c3   :  { %v233_v29 = vpop.f32.mrf.mxu3  ;;  %v609_v30 = vpop.f32.mrf.mxu2 }
 0x2c4   :  { %v610_v32 = vadd.f32 %v609_v30, %v570_v26  ;;  %v616_v33 = vadd.f32 %v615_v14, %v614_v27  ;;  %v234_v35 = vadd.f32 %v569_v7, %v233_v29 }
 0x2c6   :  { %v617_v37 = vsel %vm239_vm3, %v610_v32, 0.0  ;;  %v243_v42 = vsel %vm239_vm3, %v234_v35, 0.0 }
 0x2c7   :  { %v618_v38 = vadd.f32 %v617_v37, %v616_v33  ;;  %v244_v48 = vadd.f32 %v243_v42, %v242_v44 }
 0x2c9   :  { %v619_v40 = vrot.slane %v618_v38, 4 }
 0x2cb   :  { %v620_v45 = vadd.f32 %v619_v40, %v618_v38  ;;  %v236_v46 = vpop.f32.mrf.mxu3 }
 0x2cc   :  { %v237_v47 = vadd.f32 %v570_v26, %v236_v46 }
 0x2cd   :  { %v621_v49 = vrot.slane %v620_v45, 2 }
 0x2ce   :  { %v245_v51 = vsel %vm239_vm3, %v237_v47, 0.0 }
 0x2cf   :  { %v622_v52 = vadd.f32 %v621_v49, %v620_v45  ;;  %v246_v53 = vadd.f32 %v245_v51, %v244_v48 }
 0x2d1   :  { %v623_v54 = vrot.slane %v622_v52, 1  ;;  %v247_v55 = vrot.slane %v246_v53, 4 }
 0x2d3   :  { %v624_v57 = vadd.f32 %v623_v54, %v622_v52  ;;  %v248_v58 = vadd.f32 %v247_v55, %v246_v53 }
 0x2d5   :  { %v625_v59 = vmul.f32 %v624_v57, %v259_v56  ;;  %v249_v60 = vrot.slane %v248_v58, 2 }
 0x2d7   :  { %v1159_v61 = vsub.f32 %v601_v11, %v625_v59  ;;  %v1161_v62 = vsub.f32 %v604_v5, %v625_v59  ;;  %v1163_v63 = vsub.f32 %v607_v22, %v625_v59  ;;  %v1165_v0 = vsub.f32 %v610_v32, %v625_v59 }
 0x2d8   :  { %v250_v1 = vadd.f32 %v249_v60, %v248_v58 }
 0x2d9   :  { %v630_v2 = vmul.f32 %v1159_v61, %v1159_v61  ;;  %v631_v6 = vmul.f32 %v1161_v62, %v1161_v62  ;;  %v632_v8 = vmul.f32 %v1163_v63, %v1163_v63  ;;  %v633_v7 = vmul.f32 %v1165_v0, %v1165_v0 }
 0x2da   :  { %v251_v3 = vrot.slane %v250_v1, 1 }
 0x2db   :  { %v634_v11 = vsel %vm239_vm3, %v630_v2, 0.0  ;;  %v635_v16 = vsel %vm239_vm3, %v631_v6, 0.0  ;;  %v637_v23 = vsel %vm239_vm3, %v632_v8, 0.0  ;;  %v639_v4 = vsel %vm239_vm3, %v633_v7, 0.0  ;;  %v665_v7 = vld [vmem:[%s1355_s7 + $0x10] sm:$0xff] }
 0x2dc   :  { %v636_v21 = vadd.f32 %v635_v16, %v634_v11  ;;  %v252_v22 = vadd.f32 %v251_v3, %v250_v1  ;;  %v663_v3 = vld [vmem:[%s1355_s7] sm:$0xff] }
 0x2de   :  { %v638_v24 = vadd.f32 %v637_v23, %v636_v21  ;;  %v260_v25 = vmul.f32 %v259_v56, %v252_v22  ;;  %v671_v22 = vld [vmem:[%s1356_s8] sm:$0xff]  ;;  %v672_v23 = vld [vmem:[%s1356_s8 + $0x8] sm:$0xff] }
 0x2e0   :  { %v640_v5 = vadd.f32 %v639_v4, %v638_v24  ;;  %v1179_v14 = vsub.f32 %v228_v34, %v260_v25  ;;  %v1181_v15 = vsub.f32 %v231_v31, %v260_v25  ;;  %v1183_v26 = vsub.f32 %v234_v35, %v260_v25 }
 0x2e1   :  { %v1185_v27 = vsub.f32 %v237_v47, %v260_v25 }
 0x2e2   :  { %v641_v28 = vrot.slane %v640_v5, 4  ;;  %v265_v29 = vmul.f32 %v1179_v14, %v1179_v14  ;;  %v266_v30 = vmul.f32 %v1181_v15, %v1181_v15  ;;  %v267_v32 = vmul.f32 %v1183_v26, %v1183_v26 }
 0x2e3   :  { %v268_v34 = vmul.f32 %v1185_v27, %v1185_v27 }
 0x2e4   :  { %v642_v33 = vadd.f32 %v641_v28, %v640_v5  ;;  %v269_v31 = vsel %vm239_vm3, %v265_v29, 0.0  ;;  %v270_v35 = vsel %vm239_vm3, %v266_v30, 0.0  ;;  %v272_v38 = vsel %vm239_vm3, %v267_v32, 0.0  ;;  %v666_v30 = vld [vmem:[%s1355_s7 + $0x18] sm:$0xff] }
 0x2e5   :  { %v271_v36 = vadd.f32 %v270_v35, %v269_v31  ;;  %v274_v41 = vsel %vm239_vm3, %v268_v34, 0.0 }
 0x2e6   :  { %v643_v37 = vrot.slane %v642_v33, 2 }
 0x2e7   :  { %v273_v39 = vadd.f32 %v272_v38, %v271_v36 }
 0x2e8   :  { %v644_v40 = vadd.f32 %v643_v37, %v642_v33 }
 0x2e9   :  { %v275_v42 = vadd.f32 %v274_v41, %v273_v39 }
 0x2ea   :  { %v645_v43 = vrot.slane %v644_v40, 1 }
 0x2eb   :  { %v276_v44 = vrot.slane %v275_v42, 4 }
 0x2ec   :  { %v646_v45 = vadd.f32 %v645_v43, %v644_v40 }
 0x2ed   :  { %v277_v46 = vadd.f32 %v276_v44, %v275_v42 }
 0x2ee   :  { %v647_v47 = vmul.f32 %v646_v45, %v259_v56 }
 0x2ef   :  { %v278_v48 = vrot.slane %v277_v46, 2 }
 0x2f0   :  { %v648_v49 = vadd.f32 1e-05, %v647_v47 }
 0x2f1   :  { %v279_v50 = vadd.f32 %v278_v48, %v277_v46 }
 0x2f2   :  { %860 = vrsqrt.f32 %v648_v49  ;;  %vm655_vm6 = vweird.f32 %v648_v49 }
 0x2f3   :  { %v280_v51 = vrot.slane %v279_v50, 1 }
 0x2f5   :  { %v281_v52 = vadd.f32 %v280_v51, %v279_v50 }
 0x2f7   :  { %v282_v53 = vmul.f32 %v281_v52, %v259_v56  ;;  %v664_v56 = vld [vmem:[%s1355_s7 + $0x8] sm:$0xff]  ;;  %s961_s7 = smov [#allocation6]  }
 0x2f8   :  { %v861_v54 = vpop.eup %860 }
 0x2f9   :  { %v650_v55 = vmul.f32 %v861_v54, %v648_v49  ;;  %v283_v57 = vadd.f32 1e-05, %v282_v53  ;;  %vm656_vm5 = vweird.f32 %v861_v54 }
 0x2fa   :  { %vm657_vm7 = vmor %vm655_vm6, %vm656_vm5 }
 0x2fb   :  { %v651_v58 = vmul.f32 %v861_v54, %v650_v55  ;;  %862 = vrsqrt.f32 %v283_v57  ;;  %vm290_vm9 = vweird.f32 %v283_v57 }
 0x2fd   :  { %v652_v59 = vmul.f32 0.5, %v651_v58 }
 0x2ff   :  { %v653_v60 = vsub.f32 1.5, %v652_v59 }
 0x301   :  { %v863_v1 = vpop.eup %862  ;;  %v654_v2 = vmul.f32 %v861_v54, %v653_v60 }
 0x302   :  { %v285_v6 = vmul.f32 %v863_v1, %v283_v57  ;;  %vm291_vm8 = vweird.f32 %v863_v1 }
 0x303   :  { %v658_v8 = vsel %vm657_vm7, %v861_v54, %v654_v2  ;;  %vm292_vm10 = vmor %vm290_vm9, %vm291_vm8 }
 0x304   :  { %v659_v11 = vmul.f32 %v658_v8, %v1159_v61  ;;  %v660_v16 = vmul.f32 %v658_v8, %v1161_v62  ;;  %v661_v21 = vmul.f32 %v658_v8, %v1163_v63  ;;  %v286_v24 = vmul.f32 %v863_v1, %v285_v6  ;;  %v673_v61 = vld [vmem:[%s1356_s8 + $0x10] sm:$0xff] }
 0x305   :  { %v662_v62 = vmul.f32 %v658_v8, %v1165_v0  ;;  %v674_v0 = vld [vmem:[%s1356_s8 + $0x18] sm:$0xff]  ;;  %s796_s8 = sshll.u32 %s961_s7, 4  ;;  %s797_s8 = int_to_ptr.vmem [resolvable:$true] %s796_s8 }
 0x306   :  { %v667_v25 = vmul.f32 %v663_v3, %v659_v11  ;;  %v668_v4 = vmul.f32 %v664_v56, %v660_v16  ;;  %v669_v5 = vmul.f32 %v665_v7, %v661_v21  ;;  %v287_v28 = vmul.f32 0.5, %v286_v24 }
 0x307   :  { %v670_v36 = vmul.f32 %v666_v30, %v662_v62 }
 0x308   :  { %v675_v63 = vadd.f32 %v671_v22, %v667_v25  ;;  %v676_v29 = vadd.f32 %v672_v23, %v668_v4  ;;  %v677_v32 = vadd.f32 %v673_v61, %v669_v5  ;;  %v288_v33 = vsub.f32 1.5, %v287_v28 }
 0x309   :  { %v678_v43 = vadd.f32 %v674_v0, %v670_v36 }
 0x30a   :  { %v831_v34 = vmul.f32 -1.442695, %v675_v63  ;;  %v832_v31 = vmul.f32 -1.442695, %v676_v29  ;;  %v289_v35 = vmul.f32 %v863_v1, %v288_v33  ;;  %v833_v37 = vmul.f32 -1.442695, %v677_v32 }
 0x30c   :  { %864 = vpow2.f32 %v831_v34  ;;  %v293_v38 = vsel %vm292_vm10, %v863_v1, %v289_v35 }
 0x30d   :  { %v294_v39 = vmul.f32 %v293_v38, %v1179_v14  ;;  %v295_v40 = vmul.f32 %v293_v38, %v1181_v15  ;;  %v296_v41 = vmul.f32 %v293_v38, %v1183_v26  ;;  %866 = vpow2.f32 %v832_v31 }
 0x30e   :  { %v297_v42 = vmul.f32 %v293_v38, %v1185_v27  ;;  %868 = vpow2.f32 %v833_v37  ;;  %v834_v14 = vmul.f32 -1.442695, %v678_v43 }
 0x30f   :  { %v302_v44 = vmul.f32 %v663_v3, %v294_v39  ;;  %v303_v45 = vmul.f32 %v664_v56, %v295_v40  ;;  %v304_v46 = vmul.f32 %v665_v7, %v296_v41 }
 0x310   :  { %v305_v47 = vmul.f32 %v666_v30, %v297_v42 }
 0x311   :  { %v310_v49 = vadd.f32 %v671_v22, %v302_v44  ;;  %v311_v50 = vadd.f32 %v672_v23, %v303_v45  ;;  %v312_v51 = vadd.f32 %v673_v61, %v304_v46 }
 0x312   :  { %v865_v48 = vpop.eup %864  ;;  %v313_v52 = vadd.f32 %v674_v0, %v305_v47 }
 0x313   :  { %v691_v53 = vadd.f32 1.0, %v865_v48  ;;  %v819_v54 = vmul.f32 -1.442695, %v310_v49  ;;  %v820_v15 = vmul.f32 -1.442695, %v311_v50  ;;  %v867_v55 = vpop.eup %866 }
 0x314   :  { %v821_v26 = vmul.f32 -1.442695, %v312_v51  ;;  %v822_v27 = vmul.f32 -1.442695, %v313_v52  ;;  %v869_v57 = vpop.eup %868  ;;  %v1231_v58 = vadd.f32 1.0, %v867_v55 }
 0x315   :  { %870 = vrcp.f32 %v691_v53  ;;  %v1233_v59 = vadd.f32 1.0, %v869_v57  ;;  %v704_v16 = vand.u32 2147483647, %v691_v53  ;;  %v706_v21 = vand.u32 2147483648, %v691_v53 }
 0x316   :  { %872 = vpow2.f32 %v819_v54  ;;  %vm700_vm12 = vweird.f32 %v691_v53 }
 0x317   :  { %874 = vpow2.f32 %v820_v15  ;;  %v707_v28 = vor.u32 1.1754944e-38, %v706_v21  ;;  %vm705_vm14 = vcmp.eq.f32.partialorder %v704_v16, 8.507059e+37 }
 0x318   :  { %876 = vpow2.f32 %v834_v14 }
 0x319   :  { %878 = vpow2.f32 %v821_v26 }
 0x31a   :  { %880 = vpow2.f32 %v822_v27 }
 0x31b   :  { %v871_v60 = vpop.eup %870  ;;  %882 = vrcp.f32 %v1231_v58 }
 0x31c   :  { %v873_v1 = vpop.eup %872  ;;  %v696_v2 = vmul.f32 %v871_v60, %v691_v53  ;;  %884 = vrcp.f32 %v1233_v59  ;;  %vm701_vm11 = vweird.f32 %v871_v60 }
 0x31d   :  { %v875_v6 = vpop.eup %874  ;;  %v1236_v8 = vadd.f32 1.0, %v873_v1  ;;  %vm702_vm13 = vmor %vm700_vm12, %vm701_vm11 }
 0x31e   :  { %v877_v3 = vpop.eup %876  ;;  %v697_v56 = vsub.f32 1.0, %v696_v2  ;;  %v1238_v7 = vadd.f32 1.0, %v875_v6 }
 0x31f   :  { %v879_v11 = vpop.eup %878  ;;  %886 = vrcp.f32 %v1236_v8  ;;  %v1245_v25 = vadd.f32 1.0, %v877_v3  ;;  %v339_v62 = vand.u32 2147483647, %v1236_v8  ;;  %vm335_vm15 = vweird.f32 %v1236_v8 }
 0x320   :  { %v881_v22 = vpop.eup %880  ;;  %v698_v23 = vmul.f32 %v871_v60, %v697_v56  ;;  %v1242_v24 = vadd.f32 1.0, %v879_v11  ;;  %888 = vrcp.f32 %v1238_v7  ;;  %v354_v33 = vand.u32 2147483647, %v1238_v7 }
 0x321   :  { %v1247_v4 = vadd.f32 1.0, %v881_v22  ;;  %v1249_v5 = vpop.eup %882  ;;  %v356_v35 = vand.u32 2147483648, %v1238_v7  ;;  %v341_v0 = vand.u32 2147483648, %v1236_v8  ;;  %vm350_vm0 = vweird.f32 %v1238_v7 }
 0x322   :  { %v699_v61 = vadd.f32 %v871_v60, %v698_v23  ;;  %890 = vrcp.f32 %v1242_v24  ;;  %v1254_v63 = vpop.eup %884  ;;  %v711_v34 = vmul.f32 %v1249_v5, %v1231_v58  ;;  %vm1266_vm1 = vcmp.eq.f32.partialorder %v339_v62, 8.507059e+37 }
 0x323   :  { %892 = vrcp.f32 %v1247_v4  ;;  %v726_v39 = vmul.f32 %v1254_v63, %v1233_v59  ;;  %vm365_vm2 = vweird.f32 %v1242_v24  ;;  %v369_v41 = vand.u32 2147483647, %v1242_v24 }
 0x324   :  { %v703_v29 = vsel %vm702_vm13, %v871_v60, %v699_v61  ;;  %894 = vrcp.f32 %v1245_v25  ;;  %v371_v42 = vand.u32 2147483648, %v1242_v24  ;;  %vm1278_vm3 = vcmp.eq.f32.partialorder %v354_v33, 8.507059e+37 }
 0x325   :  { %v887_v30 = vpop.eup %886  ;;  %v708_v32 = vsel %vm705_vm14, %v707_v28, %v703_v29  ;;  %v712_v48 = vsub.f32 1.0, %v711_v34  ;;  %v357_v49 = vor.u32 1.1754944e-38, %v356_v35  ;;  %v727_v54 = vsub.f32 1.0, %v726_v39 }
 0x326   :  { %v889_v31 = vpop.eup %888  ;;  %757 = vperm.xlu2 %844, %v708_v32   ;;  %v331_v36 = vmul.f32 %v887_v30, %v1236_v8  ;;  %vm336_vm4 = vweird.f32 %v887_v30  ;;  %vm1286_vm6 = vcmp.eq.f32.partialorder %v369_v41, 8.507059e+37  ;;  %v342_v26 = vor.u32 1.1754944e-38, %v341_v0 }
 0x327   :  { %v346_v37 = vmul.f32 %v889_v31, %v1238_v7  ;;  %vm351_vm5 = vweird.f32 %v889_v31  ;;  %vm337_vm8 = vmor %vm335_vm15, %vm336_vm4  ;;  %v713_v1 = vmul.f32 %v1249_v5, %v712_v48  ;;  %v372_v2 = vor.u32 1.1754944e-38, %v371_v42 }
 0x328   :  { %v891_v40 = vpop.eup %890  ;;  %v332_v43 = vsub.f32 1.0, %v331_v36  ;;  %vm352_vm9 = vmor %vm350_vm0, %vm351_vm5  ;;  %v728_v8 = vmul.f32 %v1254_v63, %v727_v54  ;;  %vm716_vm12 = vweird.f32 %v1249_v5  ;;  %v386_v62 = vand.u32 2147483648, %v1247_v4 }
 0x329   :  { %v1275_v44 = vpop.eup %892  ;;  %v361_v45 = vmul.f32 %v891_v40, %v1242_v24  ;;  %v347_v46 = vsub.f32 1.0, %v346_v37  ;;  %vm366_vm7 = vweird.f32 %v891_v40  ;;  %v714_v28 = vadd.f32 %v1249_v5, %v713_v1  ;;  %v901_v1 = vld [vmem:[#allocation3 + $0x28] sm:$0xff] }
 0x32a   :  { %v333_v50 = vmul.f32 %v887_v30, %v332_v43  ;;  %v376_v51 = vmul.f32 %v1275_v44, %v1247_v4  ;;  %v1284_v52 = vpop.eup %894  ;;  %vm367_vm10 = vmor %vm365_vm2, %vm366_vm7  ;;  %vm381_vm11 = vweird.f32 %v1275_v44  ;;  %v721_v29 = vand.u32 2147483648, %v1231_v58 }
 0x32b   :  { %v362_v53 = vsub.f32 1.0, %v361_v45  ;;  %v348_v14 = vmul.f32 %v889_v31, %v347_v46  ;;  %v741_v56 = vmul.f32 %v1284_v52, %v1245_v25  ;;  %vm380_vm13 = vweird.f32 %v1247_v4 }
 0x32c   :  { %v334_v55 = vadd.f32 %v887_v30, %v333_v50  ;;  %v377_v27 = vsub.f32 1.0, %v376_v51  ;;  %v729_v32 = vadd.f32 %v1254_v63, %v728_v8  ;;  %vm731_vm14 = vweird.f32 %v1254_v63  ;;  %vm382_vm0 = vmor %vm380_vm13, %vm381_vm11  ;;  %v896_v51 = vld [vmem:[#allocation3 + $0x30] sm:$0xff] }
 0x32d   :  { %v363_v57 = vmul.f32 %v891_v40, %v362_v53  ;;  %v349_v60 = vadd.f32 %v889_v31, %v348_v14  ;;  %v742_v23 = vsub.f32 1.0, %v741_v56  ;;  %vm715_vm15 = vweird.f32 %v1231_v58  ;;  %v897_v53 = vld [vmem:[#allocation3 + $0x38] sm:$0xff]  ;;  %v902_v56 = vld [vmem:[#allocation3 + $0x60] sm:$0xff] }
 0x32e   :  { %v338_v6 = vsel %vm337_vm8, %v887_v30, %v334_v55  ;;  %v378_v3 = vmul.f32 %v1275_v44, %v377_v27  ;;  %v384_v30 = vand.u32 2147483647, %v1247_v4  ;;  %v719_v33 = vand.u32 2147483647, %v1231_v58 }
 0x32f   :  { %v364_v11 = vadd.f32 %v891_v40, %v363_v57  ;;  %v353_v16 = vsel %vm352_vm9, %v889_v31, %v349_v60  ;;  %v343_v21 = vsel %vm1266_vm1, %v342_v26, %v338_v6  ;;  %v736_v34 = vand.u32 2147483648, %v1233_v59  ;;  %vm717_vm1 = vmor %vm715_vm15, %vm716_vm12  ;;  %v900_v57 = vld [vmem:[#allocation3 + $0x20] sm:$0xff] }
 0x330   :  { %v358_v7 = vsel %vm1278_vm3, %v357_v49, %v353_v16  ;;  %392 = vperm.xlu2 %844, %v343_v21   ;;  %v379_v22 = vadd.f32 %v1275_v44, %v378_v3  ;;  %v743_v35 = vmul.f32 %v1284_v52, %v742_v23  ;;  %vm730_vm2 = vweird.f32 %v1233_v59  ;;  %v903_v16 = vld [vmem:[#allocation3 + $0x68] sm:$0xff] }
 0x331   :  { %v368_v61 = vsel %vm367_vm10, %v891_v40, %v364_v11  ;;  %397 = vperm.xlu1 %845, %v358_v7   ;;  %v734_v4 = vand.u32 2147483647, %v1233_v59  ;;  %v718_v36 = vsel %vm717_vm1, %v1249_v5, %v714_v28  ;;  %v387_v0 = vor.u32 1.1754944e-38, %v386_v62  ;;  %vm732_vm3 = vmor %vm730_vm2, %vm731_vm14 }
 0x332   :  { %v373_v24 = vsel %vm1286_vm6, %v372_v2, %v368_v61  ;;  %v383_v31 = vsel %vm382_vm0, %v1275_v44, %v379_v22  ;;  %v722_v37 = vor.u32 1.1754944e-38, %v721_v29  ;;  %vm385_vm4 = vcmp.eq.f32.partialorder %v384_v30, 8.507059e+37 }
 0x333   :  { %402 = vperm.xlu0 %843, %v373_v24   ;;  %v733_v58 = vsel %vm732_vm3, %v1254_v63, %v729_v32  ;;  %vm720_vm5 = vcmp.eq.f32.partialorder %v719_v33, 8.507059e+37  ;;  %v388_v38 = vsel %vm385_vm4, %v387_v0, %v383_v31  ;;  %v737_v39 = vor.u32 1.1754944e-38, %v736_v34 }
 0x334   :  { %v723_v40 = vsel %vm720_vm5, %v722_v37, %v718_v36  ;;  %v744_v41 = vadd.f32 %v1284_v52, %v743_v35  ;;  %vm746_vm6 = vweird.f32 %v1284_v52  ;;  %vm735_vm7 = vcmp.eq.f32.partialorder %v734_v4, 8.507059e+37 }
 0x335   :  { %v751_v59 = vand.u32 2147483648, %v1245_v25  ;;  %v738_v5 = vsel %vm735_vm7, %v737_v39, %v733_v58  ;;  %vm745_vm8 = vweird.f32 %v1245_v25  ;;  %v749_v42 = vand.u32 2147483647, %v1245_v25 }
 0x336   :  { %vm747_vm9 = vmor %vm745_vm8, %vm746_vm6 }
 0x337   :  { %v748_v63 = vsel %vm747_vm9, %v1284_v52, %v744_v41  ;;  %v752_v43 = vor.u32 1.1754944e-38, %v751_v59  ;;  %vm750_vm10 = vcmp.eq.f32.partialorder %v749_v42, 8.507059e+37 }
 0x338   :  { %407 = vperm.xlu2 %844, %v388_v38  }
 0x339   :  { %762 = vperm.xlu1 %845, %v723_v40   ;;  %v753_v44 = vsel %vm750_vm10, %v752_v43, %v748_v63 }
 0x33b   :  { %767 = vperm.xlu0 %843, %v738_v5  }
 0x340   :  { %772 = vperm.xlu2 %844, %v753_v44  }
 0x380   :  { %v758_v45 = vpop.permute.xlu2 %757 }
 0x381   :  { %v775_v46 = vmul.f32 %v758_v45, %v1066_v19  ;;  %v776_v47 = vmul.f32 %v758_v45, %v1068_v20 }
 0x383   :  { %784 = vst [vmem:[#allocation6 + $0x40] sm:$0xff] %v775_v46 }
 0x384   :  { %785 = vst [vmem:[#allocation6 + $0x48] sm:$0xff] %v776_v47 }
 0x38a   :  { %v393_v48 = vpop.permute.xlu2 %392 }
 0x38b   :  { %v410_v49 = vmul.f32 %v393_v48, %v1037_v9  ;;  %v411_v25 = vmul.f32 %v393_v48, %v1039_v10  ;;  %v898_v9 = vld [vmem:[#allocation3 + $0x10] sm:$0xff]  ;;  %v899_v10 = vld [vmem:[#allocation3 + $0x18] sm:$0xff] }
 0x38d   :  { %418 = vst [vmem:[#allocation6] sm:$0xff] %v410_v49 }
 0x38e   :  { %419 = vst [vmem:[#allocation6 + $0x8] sm:$0xff] %v411_v25 }
 0x392   :  { %v408_v50 = vpop.permute.xlu2 %407 }
 0x393   :  { %v416_v52 = vmul.f32 %v896_v51, %v408_v50  ;;  %v417_v14 = vmul.f32 %v897_v53, %v408_v50 }
 0x395   :  { %424 = vst [vmem:[#allocation6 + $0x30] sm:$0xff] %v416_v52 }
 0x396   :  { %425 = vst [vmem:[#allocation6 + $0x38] sm:$0xff] %v417_v14 }
 0x39a   :  { %v773_v54 = vpop.permute.xlu2 %772 }
 0x39b   :  { %v781_v19 = vmul.f32 %v773_v54, %v1046_v12  ;;  %v782_v20 = vmul.f32 %v773_v54, %v1048_v13 }
 0x39d   :  { %790 = vst [vmem:[#allocation6 + $0x70] sm:$0xff] %v781_v19 }
 0x39e   :  { %791 = vst [vmem:[#allocation6 + $0x78] sm:$0xff] %v782_v20 }
 0x3a3   :  { %v398_v15 = vpop.permute.xlu1 %397 }
 0x3a4   :  { %v412_v55 = vmul.f32 %v898_v9, %v398_v15  ;;  %v413_v26 = vmul.f32 %v899_v10, %v398_v15 }
 0x3a5   :  { %v403_v27 = vpop.permute.xlu0 %402 }
 0x3a6   :  { %v414_v60 = vmul.f32 %v900_v57, %v403_v27  ;;  %v415_v2 = vmul.f32 %v901_v1, %v403_v27  ;;  %420 = vst [vmem:[#allocation6 + $0x10] sm:$0xff] %v412_v55 }
 0x3a7   :  { %421 = vst [vmem:[#allocation6 + $0x18] sm:$0xff] %v413_v26 }
 0x3a8   :  { %422 = vst [vmem:[#allocation6 + $0x20] sm:$0xff] %v414_v60 }
 0x3a9   :  { %423 = vst [vmem:[#allocation6 + $0x28] sm:$0xff] %v415_v2 }
 0x3ab   :  { %v763_v6 = vpop.permute.xlu1 %762 }
 0x3ac   :  { %v777_v12 = vmul.f32 %v763_v6, %v1060_v17  ;;  %v778_v13 = vmul.f32 %v763_v6, %v1062_v18 }
 0x3ad   :  { %v768_v3 = vpop.permute.xlu0 %767 }
 0x3ae   :  { %v779_v11 = vmul.f32 %v902_v56, %v768_v3  ;;  %v780_v21 = vmul.f32 %v903_v16, %v768_v3  ;;  %786 = vst [vmem:[#allocation6 + $0x50] sm:$0xff] %v777_v12 }
 0x3af   :  { %787 = vst [vmem:[#allocation6 + $0x58] sm:$0xff] %v778_v13 }
 0x3b0   :  { %788 = vst [vmem:[#allocation6 + $0x60] sm:$0xff] %v779_v11 }
 0x3b1   :  { %789 = vst [vmem:[#allocation6 + $0x68] sm:$0xff] %v780_v21 }
 0x3b2   :  { %804 = dma.vmem_to_hbm [thread:$0]  %s797_s8, 2048, %s799_s12, [#allocation5], %s957_s16, %s957_s16, %s958_s17  }
 0x3b3   :  { %954 = dma.done.wait [#allocation5], 2048  }
 0x3b4   :  { %955 = vsyncadd [#allocation5], 4294965248 }
 0x3b5   :  { %809 = vsyncpa [#allocation4], 1 }
 0x3b6   :  { %810 = vsyncpa [#allocation5], 1 }

</bundles_post_ra>
